<compile_context>
chip_gen: v7x
topology: tpu7x:2x2x1
jax: 0.10.0
libtpu: 0.0.40
codegen_flags: <defaults>
</compile_context>

<pallas_src>
import jax
import jax.numpy as jnp
from jax.experimental import pallas as pl
from jax.experimental.pallas import tpu as pltpu

# Model hyper-parameters (tiny BERT-like main_model).
B, S, H = 2, 8, 32          # batch, sequence length, hidden size
NH, HD = 2, 16              # attention heads, head dim (NH * HD == H)
FFN = 64                    # feed-forward intermediate size
VOCAB = 100                 # vocab size for word embeddings
MAX_POS = 64                # max position embeddings
N_TYPES = 2                 # token-type vocabulary
EPS = 1e-12                 # BERT layer-norm epsilon
BS = B * S

# Packed bias / layer-norm slab: rows (all padded to 3H lanes).
(R_LN0G, R_LN0B, R_BQKV, R_BO, R_LN1G, R_LN1B,
 R_B1, R_B2, R_LN2G, R_LN2B, R_BP) = range(11)
VECW = 3 * H                # lane width of the bias/LN slab

# Packed matmul-weight slab: column offsets (every block stored with H rows;
# the FFN down-projection w2 (FFN, H) is stored transposed as (H, FFN)).
C_QKV = 0                   # [0, 3H)          : wq*scale | wk | wv
C_WO = 3 * H                # [3H, 4H)         : attention output projection
C_W1 = 4 * H                # [4H, 4H+FFN)     : FFN up-projection
C_W2T = 4 * H + FFN         # [4H+FFN, 4H+2F)  : FFN down-projection, transposed
C_WP = 4 * H + 2 * FFN      # [4H+2F, 5H+2F)   : pooler dense
WSLAB_COLS = 5 * H + 2 * FFN


def _layer_norm(x, g, b):
    mu = jnp.mean(x, axis=-1, keepdims=True)
    var = jnp.mean((x - mu) ** 2, axis=-1, keepdims=True)
    return (x - mu) * jax.lax.rsqrt(var + EPS) * g + b


def fused_bert_pooler_kernel(x_ref, mask_ref, wslab_ref, vec_ref, out_ref):
    f32, bf16 = jnp.float32, jnp.bfloat16

    x = x_ref[...]            # (B*S, H)          f32 summed embeddings
    mask_add = mask_ref[...]  # (B, B*S)          f32 block-diag + padding mask
    wslab = wslab_ref[...]    # (H, 5H+2*FFN)     bf16 packed matmul weights
    vec = vec_ref[...]        # (11, 3H)          f32 packed biases / LN params

    ln0_g, ln0_b = vec[R_LN0G:R_LN0G + 1, :H], vec[R_LN0B:R_LN0B + 1, :H]
    b_qkv        = vec[R_BQKV:R_BQKV + 1, :3 * H]
    b_o          = vec[R_BO:R_BO + 1, :H]
    ln1_g, ln1_b = vec[R_LN1G:R_LN1G + 1, :H], vec[R_LN1B:R_LN1B + 1, :H]
    b_1          = vec[R_B1:R_B1 + 1, :FFN]
    b_2          = vec[R_B2:R_B2 + 1, :H]
    ln2_g, ln2_b = vec[R_LN2G:R_LN2G + 1, :H], vec[R_LN2B:R_LN2B + 1, :H]
    b_p          = vec[R_BP:R_BP + 1, :H]

    # ---- embedding layer-norm over all B*S rows (K/V need every token) ------
    h = _layer_norm(x, ln0_g, ln0_b)                              # (B*S, H)

    # ---- fused QKV projection: one bf16 MXU issue + one bias add ------------
    qkv = jnp.dot(h.astype(bf16), wslab[:, C_QKV:C_QKV + 3 * H],
                  preferred_element_type=f32) + b_qkv             # (B*S, 3H)

    # Only the [CLS] row of each batch element feeds the pooler, so the
    # attention query / residual / FFN / pooler tail runs on B rows only.
    h_cls = h.reshape(B, S, H)[:, 0:1, :].reshape(B, H)           # (B, H)
    q_cls = qkv.reshape(B, S, 3 * H)[:, 0:1, :H].reshape(B, H)    # (B, H), pre-scaled
    k = qkv[:, H:2 * H]                                           # (B*S, H)
    v = qkv[:, 2 * H:3 * H]                                       # (B*S, H)

    q_bf, k_bf, v_bf = q_cls.astype(bf16), k.astype(bf16), v.astype(bf16)
    wo = wslab[:, C_WO:C_WO + H]                                  # (H, H) bf16

    # ---- attention for the CLS queries, all batch elements at once ----------
    # Cross-batch and padded-key interactions are disabled by the additive
    # block-diagonal mask prepared in the wrapper.  Heads are a static NH=2
    # loop; each head's context is folded straight into the output projection.
    attn_out = b_o                                                # (1, H) -> bcast
    for hh in range(NH):
        sl = slice(hh * HD, (hh + 1) * HD)
        scores = jnp.dot(q_bf[:, sl], k_bf[:, sl].T,
                         preferred_element_type=f32) + mask_add   # (B, B*S)
        scores = scores - jnp.max(scores, axis=-1, keepdims=True)
        p = jnp.exp(scores)
        p = p * pl.reciprocal(jnp.sum(p, axis=-1, keepdims=True), approx=True)
        ctx_h = jnp.dot(p.astype(bf16), v_bf[:, sl],
                        preferred_element_type=f32)               # (B, HD)
        attn_out = attn_out + jnp.dot(ctx_h.astype(bf16), wo[sl, :],
                                      preferred_element_type=f32)  # (B, H)

    h1 = _layer_norm(h_cls + attn_out, ln1_g, ln1_b)              # (B, H)

    # ---- feed-forward + pooler, CLS rows only --------------------------------
    f = jnp.dot(h1.astype(bf16), wslab[:, C_W1:C_W1 + FFN],
                preferred_element_type=f32) + b_1                 # (B, FFN)
    # TODO(synk): HF BERT's default intermediate activation is exact (erf) GELU;
    # the tanh approximation is used here for guaranteed Mosaic lowering and
    # differs by a tiny numerical amount.
    f = jax.nn.gelu(f, approximate=True)
    w2t = wslab[:, C_W2T:C_W2T + FFN]                             # (H, FFN) = w2.T
    f = jnp.dot(f.astype(bf16), w2t.T, preferred_element_type=f32) + b_2
    h2 = _layer_norm(h1 + f, ln2_g, ln2_b)                        # (B, H)

    pooled = jnp.tanh(jnp.dot(h2.astype(bf16), wslab[:, C_WP:C_WP + H],
                              preferred_element_type=f32) + b_p)  # (B, H)

    # TODO(synk): Dropout(p=0.1) is identity at inference; training-mode dropout
    # would use pltpu.prng_seed / pltpu.prng_random_bits for a stochastic mask.
    out_ref[...] = pooled.astype(out_ref.dtype)


def init_params(key):
    ks = jax.random.split(key, 16)
    s = 0.02
    return {
        "word_emb": jax.random.normal(ks[0], (VOCAB, H), jnp.float32) * s,
        "pos_emb":  jax.random.normal(ks[1], (MAX_POS, H), jnp.float32) * s,
        "type_emb": jax.random.normal(ks[2], (N_TYPES, H), jnp.float32) * s,
        "ln0_g": jnp.ones((1, H), jnp.float32),
        "ln0_b": jnp.zeros((1, H), jnp.float32),
        "wq": jax.random.normal(ks[3], (H, H), jnp.float32) * s,
        "bq": jnp.zeros((1, H), jnp.float32),
        "wk": jax.random.normal(ks[4], (H, H), jnp.float32) * s,
        "bk": jnp.zeros((1, H), jnp.float32),
        "wv": jax.random.normal(ks[5], (H, H), jnp.float32) * s,
        "bv": jnp.zeros((1, H), jnp.float32),
        "wo": jax.random.normal(ks[6], (H, H), jnp.float32) * s,
        "bo": jnp.zeros((1, H), jnp.float32),
        "ln1_g": jnp.ones((1, H), jnp.float32),
        "ln1_b": jnp.zeros((1, H), jnp.float32),
        "w1": jax.random.normal(ks[7], (H, FFN), jnp.float32) * s,
        "b1": jnp.zeros((1, FFN), jnp.float32),
        "w2": jax.random.normal(ks[8], (FFN, H), jnp.float32) * s,
        "b2": jnp.zeros((1, H), jnp.float32),
        "ln2_g": jnp.ones((1, H), jnp.float32),
        "ln2_b": jnp.zeros((1, H), jnp.float32),
        "wp": jax.random.normal(ks[9], (H, H), jnp.float32) * s,
        "bp": jnp.zeros((1, H), jnp.float32),
    }


def _pack_weights(params):
    """Pack 20 small tensors into 2 slabs; fold 1/sqrt(HD) into the Q columns."""
    scale = 1.0 / (HD ** 0.5)
    wqkv = jnp.concatenate([params["wq"] * scale, params["wk"], params["wv"]], axis=1)
    wslab = jnp.concatenate(
        [wqkv, params["wo"], params["w1"], params["w2"].T, params["wp"]],
        axis=1).astype(jnp.bfloat16)                              # (H, 5H+2F) bf16
    assert wslab.shape == (H, WSLAB_COLS)

    def row(name):
        v = params[name]
        return jnp.pad(v, ((0, 0), (0, VECW - v.shape[1])))

    b_qkv = jnp.concatenate([params["bq"] * scale, params["bk"], params["bv"]], axis=1)
    vec = jnp.concatenate([
        row("ln0_g"), row("ln0_b"),
        b_qkv,
        row("bo"), row("ln1_g"), row("ln1_b"),
        row("b1"), row("b2"),
        row("ln2_g"), row("ln2_b"),
        row("bp"),
    ], axis=0).astype(jnp.float32)                                # (11, 3H) f32
    return wslab, vec


def big_model_forward(params, tok, att):
    """BigModel.forward: typ=zeros, pooled = main_model(...)['pooler'], dropout."""
    # ---- glue in plain JAX: embedding gathers, mask prep, weight packing -----
    typ = jnp.zeros_like(tok)                                     # torch.zeros(...).long()
    emb = (jnp.take(params["word_emb"], tok, axis=0)
           + jnp.take(params["type_emb"], typ, axis=0)
           + params["pos_emb"][:S][None, :, :])                   # (B, S, H)
    x2d = emb.reshape(B * S, H).astype(jnp.float32)

    # Additive mask: the CLS query of batch b may only attend to valid
    # (non-padded) keys of the same batch element (block-diagonal over batch).
    key_batch = jnp.repeat(jnp.arange(B), S)                      # (B*S,)
    same_batch = jnp.arange(B)[:, None] == key_batch[None, :]     # (B, B*S)
    valid_key = (att.reshape(-1) > 0)[None, :]                    # (1, B*S)
    mask_add = jnp.where(same_batch & valid_key, 0.0, -1e9).astype(jnp.float32)

    wslab, vec = _pack_weights(params)

    vmem = pl.BlockSpec(memory_space=pltpu.MemorySpace.VMEM)
    pooled = pl.pallas_call(
        fused_bert_pooler_kernel,
        out_shape=jax.ShapeDtypeStruct((B, H), jnp.float32),
        in_specs=[vmem, vmem, vmem, vmem],
        out_specs=vmem,
    )(x2d, mask_add, wslab, vec)

    # Dropout(0.1) -> identity in inference mode.
    logits = pooled
    return logits


if __name__ == "__main__":
    key = jax.random.PRNGKey(0)
    pkey, tkey = jax.random.split(key)
    params = init_params(pkey)

    tok = jax.random.randint(tkey, (B, S), 0, VOCAB, dtype=jnp.int32)
    # attention mask: first sequence fully valid, second padded after 5 tokens
    att = jnp.stack([jnp.ones((S,), jnp.int32),
                     (jnp.arange(S) < 5).astype(jnp.int32)], axis=0)

    logits = jax.jit(big_model_forward)(params, tok, att)
    jax.block_until_ready(logits)
    assert logits.shape == (B, H)
    assert bool(jnp.all(jnp.isfinite(logits)))
    print("KERNEL_OK")
</pallas_src>

<mosaic_0001>
module attributes {stable_mosaic.version = 11 : i64} {
  func.func @fused_bert_pooler_kernel(%arg0: memref<16x32xf32, #tpu.memory_space<vmem>>, %arg1: memref<2x16xf32, #tpu.memory_space<vmem>>, %arg2: memref<32x288xbf16, #tpu.memory_space<vmem>>, %arg3: memref<11x96xf32, #tpu.memory_space<vmem>>, %arg4: memref<2x32xf32, #tpu.memory_space<vmem>>) attributes {dimension_semantics = [], scalar_prefetch = 0 : i64, scratch_operands = 0 : i64, tpu.core_type = #tpu.core_type<tc>} {
    %c0 = arith.constant 0 : index
    %c0_0 = arith.constant 0 : index
    %0 = vector.load %arg0[%c0, %c0_0] : memref<16x32xf32, #tpu.memory_space<vmem>>, vector<16x32xf32>
    %c0_1 = arith.constant 0 : index
    %c0_2 = arith.constant 0 : index
    %1 = vector.load %arg1[%c0_1, %c0_2] : memref<2x16xf32, #tpu.memory_space<vmem>>, vector<2x16xf32>
    %c0_3 = arith.constant 0 : index
    %c0_4 = arith.constant 0 : index
    %2 = vector.load %arg2[%c0_3, %c0_4] : memref<32x288xbf16, #tpu.memory_space<vmem>>, vector<32x288xbf16>
    %c0_5 = arith.constant 0 : index
    %c0_6 = arith.constant 0 : index
    %3 = vector.load %arg3[%c0_5, %c0_6] : memref<11x96xf32, #tpu.memory_space<vmem>>, vector<11x96xf32>
    %4 = vector.extract_strided_slice %3 {offsets = [0, 0], sizes = [1, 32], strides = [1, 1]} : vector<11x96xf32> to vector<1x32xf32>
    %5 = vector.extract_strided_slice %3 {offsets = [1, 0], sizes = [1, 32], strides = [1, 1]} : vector<11x96xf32> to vector<1x32xf32>
    %6 = vector.extract_strided_slice %3 {offsets = [2, 0], sizes = [1, 96], strides = [1, 1]} : vector<11x96xf32> to vector<1x96xf32>
    %7 = vector.extract_strided_slice %3 {offsets = [3, 0], sizes = [1, 32], strides = [1, 1]} : vector<11x96xf32> to vector<1x32xf32>
    %8 = vector.extract_strided_slice %3 {offsets = [4, 0], sizes = [1, 32], strides = [1, 1]} : vector<11x96xf32> to vector<1x32xf32>
    %9 = vector.extract_strided_slice %3 {offsets = [5, 0], sizes = [1, 32], strides = [1, 1]} : vector<11x96xf32> to vector<1x32xf32>
    %10 = vector.extract_strided_slice %3 {offsets = [6, 0], sizes = [1, 64], strides = [1, 1]} : vector<11x96xf32> to vector<1x64xf32>
    %11 = vector.extract_strided_slice %3 {offsets = [7, 0], sizes = [1, 32], strides = [1, 1]} : vector<11x96xf32> to vector<1x32xf32>
    %12 = vector.extract_strided_slice %3 {offsets = [8, 0], sizes = [1, 32], strides = [1, 1]} : vector<11x96xf32> to vector<1x32xf32>
    %13 = vector.extract_strided_slice %3 {offsets = [9, 0], sizes = [1, 32], strides = [1, 1]} : vector<11x96xf32> to vector<1x32xf32>
    %14 = vector.extract_strided_slice %3 {offsets = [10, 0], sizes = [1, 32], strides = [1, 1]} : vector<11x96xf32> to vector<1x32xf32>
    %cst = arith.constant dense<0.000000e+00> : vector<16xf32>
    %15 = vector.multi_reduction <add>, %0, %cst [1] : vector<16x32xf32> to vector<16xf32>
    %16 = vector.shape_cast %15 : vector<16xf32> to vector<16x1xf32>
    %cst_7 = arith.constant 3.200000e+01 : f32
    %17 = vector.broadcast %cst_7 : f32 to vector<16x1xf32>
    %18 = arith.divf %16, %17 : vector<16x1xf32>
    %19 = vector.broadcast %18 : vector<16x1xf32> to vector<16x32xf32>
    %20 = arith.subf %0, %19 : vector<16x32xf32>
    %21 = arith.mulf %20, %20 : vector<16x32xf32>
    %cst_8 = arith.constant dense<0.000000e+00> : vector<16xf32>
    %22 = vector.multi_reduction <add>, %21, %cst_8 [1] : vector<16x32xf32> to vector<16xf32>
    %23 = vector.shape_cast %22 : vector<16xf32> to vector<16x1xf32>
    %cst_9 = arith.constant 3.200000e+01 : f32
    %24 = vector.broadcast %cst_9 : f32 to vector<16x1xf32>
    %25 = arith.divf %23, %24 : vector<16x1xf32>
    %26 = vector.broadcast %18 : vector<16x1xf32> to vector<16x32xf32>
    %27 = arith.subf %0, %26 : vector<16x32xf32>
    %cst_10 = arith.constant 9.99999996E-13 : f32
    %28 = vector.broadcast %cst_10 : f32 to vector<16x1xf32>
    %29 = arith.addf %25, %28 : vector<16x1xf32>
    %30 = math.rsqrt %29 : vector<16x1xf32>
    %31 = vector.broadcast %30 : vector<16x1xf32> to vector<16x32xf32>
    %32 = arith.mulf %27, %31 : vector<16x32xf32>
    %33 = vector.broadcast %4 : vector<1x32xf32> to vector<16x32xf32>
    %34 = arith.mulf %32, %33 : vector<16x32xf32>
    %35 = vector.broadcast %5 : vector<1x32xf32> to vector<16x32xf32>
    %36 = arith.addf %34, %35 : vector<16x32xf32>
    %37 = arith.truncf %36 : vector<16x32xf32> to vector<16x32xbf16>
    %38 = vector.extract_strided_slice %2 {offsets = [0, 0], sizes = [32, 96], strides = [1, 1]} : vector<32x288xbf16> to vector<32x96xbf16>
    %cst_11 = arith.constant dense<0.000000e+00> : vector<16x96xf32>
    %39 = tpu.matmul %37, %38, %cst_11 {dimension_numbers = #tpu.dot_dimension_numbers<[1], [0], [0], [1], [0, 0, 1, 1], [], []>} : vector<16x32xbf16>, vector<32x96xbf16>, vector<16x96xf32> -> vector<16x96xf32>
    %40 = vector.broadcast %6 : vector<1x96xf32> to vector<16x96xf32>
    %41 = arith.addf %39, %40 : vector<16x96xf32>
    %42 = vector.shape_cast %36 : vector<16x32xf32> to vector<2x8x32xf32>
    %43 = vector.extract_strided_slice %42 {offsets = [0, 0, 0], sizes = [2, 1, 32], strides = [1, 1, 1]} : vector<2x8x32xf32> to vector<2x1x32xf32>
    %44 = vector.shape_cast %43 : vector<2x1x32xf32> to vector<2x32xf32>
    %45 = vector.shape_cast %41 : vector<16x96xf32> to vector<2x8x96xf32>
    %46 = vector.extract_strided_slice %45 {offsets = [0, 0, 0], sizes = [2, 1, 32], strides = [1, 1, 1]} : vector<2x8x96xf32> to vector<2x1x32xf32>
    %47 = vector.shape_cast %46 : vector<2x1x32xf32> to vector<2x32xf32>
    %48 = vector.extract_strided_slice %41 {offsets = [0, 32], sizes = [16, 32], strides = [1, 1]} : vector<16x96xf32> to vector<16x32xf32>
    %49 = vector.extract_strided_slice %41 {offsets = [0, 64], sizes = [16, 32], strides = [1, 1]} : vector<16x96xf32> to vector<16x32xf32>
    %50 = arith.truncf %47 : vector<2x32xf32> to vector<2x32xbf16>
    %51 = arith.truncf %48 : vector<16x32xf32> to vector<16x32xbf16>
    %52 = arith.truncf %49 : vector<16x32xf32> to vector<16x32xbf16>
    %53 = vector.extract_strided_slice %2 {offsets = [0, 96], sizes = [32, 32], strides = [1, 1]} : vector<32x288xbf16> to vector<32x32xbf16>
    %54 = vector.extract_strided_slice %50 {offsets = [0, 0], sizes = [2, 16], strides = [1, 1]} : vector<2x32xbf16> to vector<2x16xbf16>
    %55 = vector.extract_strided_slice %51 {offsets = [0, 0], sizes = [16, 16], strides = [1, 1]} : vector<16x32xbf16> to vector<16x16xbf16>
    %56 = tpu.transpose %55, [1, 0] : vector<16x16xbf16> -> vector<16x16xbf16>
    %cst_12 = arith.constant dense<0.000000e+00> : vector<2x16xf32>
    %57 = tpu.matmul %54, %56, %cst_12 {dimension_numbers = #tpu.dot_dimension_numbers<[1], [0], [0], [1], [0, 0, 1, 1], [], []>} : vector<2x16xbf16>, vector<16x16xbf16>, vector<2x16xf32> -> vector<2x16xf32>
    %58 = arith.addf %57, %1 : vector<2x16xf32>
    %cst_13 = arith.constant dense<0xFF800000> : vector<2xf32>
    %59 = vector.multi_reduction <maximumf>, %58, %cst_13 [1] : vector<2x16xf32> to vector<2xf32>
    %60 = vector.shape_cast %59 : vector<2xf32> to vector<2x1xf32>
    %61 = vector.broadcast %60 : vector<2x1xf32> to vector<2x16xf32>
    %62 = arith.subf %58, %61 : vector<2x16xf32>
    %63 = math.exp %62 : vector<2x16xf32>
    %cst_14 = arith.constant dense<0.000000e+00> : vector<2xf32>
    %64 = vector.multi_reduction <add>, %63, %cst_14 [1] : vector<2x16xf32> to vector<2xf32>
    %65 = vector.shape_cast %64 : vector<2xf32> to vector<2x1xf32>
    %66 = tpu.reciprocal %65 {approx = true} : vector<2x1xf32> -> vector<2x1xf32>
    %67 = vector.broadcast %66 : vector<2x1xf32> to vector<2x16xf32>
    %68 = arith.mulf %63, %67 : vector<2x16xf32>
    %69 = arith.truncf %68 : vector<2x16xf32> to vector<2x16xbf16>
    %70 = vector.extract_strided_slice %52 {offsets = [0, 0], sizes = [16, 16], strides = [1, 1]} : vector<16x32xbf16> to vector<16x16xbf16>
    %cst_15 = arith.constant dense<0.000000e+00> : vector<2x16xf32>
    %71 = tpu.matmul %69, %70, %cst_15 {dimension_numbers = #tpu.dot_dimension_numbers<[1], [0], [0], [1], [0, 0, 1, 1], [], []>} : vector<2x16xbf16>, vector<16x16xbf16>, vector<2x16xf32> -> vector<2x16xf32>
    %72 = arith.truncf %71 : vector<2x16xf32> to vector<2x16xbf16>
    %73 = vector.extract_strided_slice %53 {offsets = [0, 0], sizes = [16, 32], strides = [1, 1]} : vector<32x32xbf16> to vector<16x32xbf16>
    %cst_16 = arith.constant dense<0.000000e+00> : vector<2x32xf32>
    %74 = tpu.matmul %72, %73, %cst_16 {dimension_numbers = #tpu.dot_dimension_numbers<[1], [0], [0], [1], [0, 0, 1, 1], [], []>} : vector<2x16xbf16>, vector<16x32xbf16>, vector<2x32xf32> -> vector<2x32xf32>
    %75 = vector.broadcast %7 : vector<1x32xf32> to vector<2x32xf32>
    %76 = arith.addf %75, %74 : vector<2x32xf32>
    %77 = vector.extract_strided_slice %50 {offsets = [0, 16], sizes = [2, 16], strides = [1, 1]} : vector<2x32xbf16> to vector<2x16xbf16>
    %78 = vector.extract_strided_slice %51 {offsets = [0, 16], sizes = [16, 16], strides = [1, 1]} : vector<16x32xbf16> to vector<16x16xbf16>
    %79 = tpu.transpose %78, [1, 0] : vector<16x16xbf16> -> vector<16x16xbf16>
    %cst_17 = arith.constant dense<0.000000e+00> : vector<2x16xf32>
    %80 = tpu.matmul %77, %79, %cst_17 {dimension_numbers = #tpu.dot_dimension_numbers<[1], [0], [0], [1], [0, 0, 1, 1], [], []>} : vector<2x16xbf16>, vector<16x16xbf16>, vector<2x16xf32> -> vector<2x16xf32>
    %81 = arith.addf %80, %1 : vector<2x16xf32>
    %cst_18 = arith.constant dense<0xFF800000> : vector<2xf32>
    %82 = vector.multi_reduction <maximumf>, %81, %cst_18 [1] : vector<2x16xf32> to vector<2xf32>
    %83 = vector.shape_cast %82 : vector<2xf32> to vector<2x1xf32>
    %84 = vector.broadcast %83 : vector<2x1xf32> to vector<2x16xf32>
    %85 = arith.subf %81, %84 : vector<2x16xf32>
    %86 = math.exp %85 : vector<2x16xf32>
    %cst_19 = arith.constant dense<0.000000e+00> : vector<2xf32>
    %87 = vector.multi_reduction <add>, %86, %cst_19 [1] : vector<2x16xf32> to vector<2xf32>
    %88 = vector.shape_cast %87 : vector<2xf32> to vector<2x1xf32>
    %89 = tpu.reciprocal %88 {approx = true} : vector<2x1xf32> -> vector<2x1xf32>
    %90 = vector.broadcast %89 : vector<2x1xf32> to vector<2x16xf32>
    %91 = arith.mulf %86, %90 : vector<2x16xf32>
    %92 = arith.truncf %91 : vector<2x16xf32> to vector<2x16xbf16>
    %93 = vector.extract_strided_slice %52 {offsets = [0, 16], sizes = [16, 16], strides = [1, 1]} : vector<16x32xbf16> to vector<16x16xbf16>
    %cst_20 = arith.constant dense<0.000000e+00> : vector<2x16xf32>
    %94 = tpu.matmul %92, %93, %cst_20 {dimension_numbers = #tpu.dot_dimension_numbers<[1], [0], [0], [1], [0, 0, 1, 1], [], []>} : vector<2x16xbf16>, vector<16x16xbf16>, vector<2x16xf32> -> vector<2x16xf32>
    %95 = arith.truncf %94 : vector<2x16xf32> to vector<2x16xbf16>
    %96 = vector.extract_strided_slice %53 {offsets = [16, 0], sizes = [16, 32], strides = [1, 1]} : vector<32x32xbf16> to vector<16x32xbf16>
    %cst_21 = arith.constant dense<0.000000e+00> : vector<2x32xf32>
    %97 = tpu.matmul %95, %96, %cst_21 {dimension_numbers = #tpu.dot_dimension_numbers<[1], [0], [0], [1], [0, 0, 1, 1], [], []>} : vector<2x16xbf16>, vector<16x32xbf16>, vector<2x32xf32> -> vector<2x32xf32>
    %98 = arith.addf %76, %97 : vector<2x32xf32>
    %99 = arith.addf %44, %98 : vector<2x32xf32>
    %cst_22 = arith.constant dense<0.000000e+00> : vector<2xf32>
    %100 = vector.multi_reduction <add>, %99, %cst_22 [1] : vector<2x32xf32> to vector<2xf32>
    %101 = vector.shape_cast %100 : vector<2xf32> to vector<2x1xf32>
    %cst_23 = arith.constant 3.200000e+01 : f32
    %102 = vector.broadcast %cst_23 : f32 to vector<2x1xf32>
    %103 = arith.divf %101, %102 : vector<2x1xf32>
    %104 = vector.broadcast %103 : vector<2x1xf32> to vector<2x32xf32>
    %105 = arith.subf %99, %104 : vector<2x32xf32>
    %106 = arith.mulf %105, %105 : vector<2x32xf32>
    %cst_24 = arith.constant dense<0.000000e+00> : vector<2xf32>
    %107 = vector.multi_reduction <add>, %106, %cst_24 [1] : vector<2x32xf32> to vector<2xf32>
    %108 = vector.shape_cast %107 : vector<2xf32> to vector<2x1xf32>
    %cst_25 = arith.constant 3.200000e+01 : f32
    %109 = vector.broadcast %cst_25 : f32 to vector<2x1xf32>
    %110 = arith.divf %108, %109 : vector<2x1xf32>
    %111 = vector.broadcast %103 : vector<2x1xf32> to vector<2x32xf32>
    %112 = arith.subf %99, %111 : vector<2x32xf32>
    %cst_26 = arith.constant 9.99999996E-13 : f32
    %113 = vector.broadcast %cst_26 : f32 to vector<2x1xf32>
    %114 = arith.addf %110, %113 : vector<2x1xf32>
    %115 = math.rsqrt %114 : vector<2x1xf32>
    %116 = vector.broadcast %115 : vector<2x1xf32> to vector<2x32xf32>
    %117 = arith.mulf %112, %116 : vector<2x32xf32>
    %118 = vector.broadcast %8 : vector<1x32xf32> to vector<2x32xf32>
    %119 = arith.mulf %117, %118 : vector<2x32xf32>
    %120 = vector.broadcast %9 : vector<1x32xf32> to vector<2x32xf32>
    %121 = arith.addf %119, %120 : vector<2x32xf32>
    %122 = arith.truncf %121 : vector<2x32xf32> to vector<2x32xbf16>
    %123 = vector.extract_strided_slice %2 {offsets = [0, 128], sizes = [32, 64], strides = [1, 1]} : vector<32x288xbf16> to vector<32x64xbf16>
    %cst_27 = arith.constant dense<0.000000e+00> : vector<2x64xf32>
    %124 = tpu.matmul %122, %123, %cst_27 {dimension_numbers = #tpu.dot_dimension_numbers<[1], [0], [0], [1], [0, 0, 1, 1], [], []>} : vector<2x32xbf16>, vector<32x64xbf16>, vector<2x64xf32> -> vector<2x64xf32>
    %125 = vector.broadcast %10 : vector<1x64xf32> to vector<2x64xf32>
    %126 = arith.addf %124, %125 : vector<2x64xf32>
    %127 = arith.mulf %126, %126 : vector<2x64xf32>
    %128 = arith.mulf %126, %127 : vector<2x64xf32>
    %cst_28 = arith.constant 4.471500e-02 : f32
    %129 = vector.broadcast %cst_28 : f32 to vector<2x64xf32>
    %130 = arith.mulf %129, %128 : vector<2x64xf32>
    %131 = arith.addf %126, %130 : vector<2x64xf32>
    %cst_29 = arith.constant 0.797884583 : f32
    %132 = vector.broadcast %cst_29 : f32 to vector<2x64xf32>
    %133 = arith.mulf %132, %131 : vector<2x64xf32>
    %134 = math.tanh %133 : vector<2x64xf32>
    %cst_30 = arith.constant 1.000000e+00 : f32
    %135 = vector.broadcast %cst_30 : f32 to vector<2x64xf32>
    %136 = arith.addf %135, %134 : vector<2x64xf32>
    %cst_31 = arith.constant 5.000000e-01 : f32
    %137 = vector.broadcast %cst_31 : f32 to vector<2x64xf32>
    %138 = arith.mulf %137, %136 : vector<2x64xf32>
    %139 = arith.mulf %126, %138 : vector<2x64xf32>
    %140 = vector.extract_strided_slice %2 {offsets = [0, 192], sizes = [32, 64], strides = [1, 1]} : vector<32x288xbf16> to vector<32x64xbf16>
    %141 = arith.truncf %139 : vector<2x64xf32> to vector<2x64xbf16>
    %142 = tpu.transpose %140, [1, 0] : vector<32x64xbf16> -> vector<64x32xbf16>
    %cst_32 = arith.constant dense<0.000000e+00> : vector<2x32xf32>
    %143 = tpu.matmul %141, %142, %cst_32 {dimension_numbers = #tpu.dot_dimension_numbers<[1], [0], [0], [1], [0, 0, 1, 1], [], []>} : vector<2x64xbf16>, vector<64x32xbf16>, vector<2x32xf32> -> vector<2x32xf32>
    %144 = vector.broadcast %11 : vector<1x32xf32> to vector<2x32xf32>
    %145 = arith.addf %143, %144 : vector<2x32xf32>
    %146 = arith.addf %121, %145 : vector<2x32xf32>
    %cst_33 = arith.constant dense<0.000000e+00> : vector<2xf32>
    %147 = vector.multi_reduction <add>, %146, %cst_33 [1] : vector<2x32xf32> to vector<2xf32>
    %148 = vector.shape_cast %147 : vector<2xf32> to vector<2x1xf32>
    %cst_34 = arith.constant 3.200000e+01 : f32
    %149 = vector.broadcast %cst_34 : f32 to vector<2x1xf32>
    %150 = arith.divf %148, %149 : vector<2x1xf32>
    %151 = vector.broadcast %150 : vector<2x1xf32> to vector<2x32xf32>
    %152 = arith.subf %146, %151 : vector<2x32xf32>
    %153 = arith.mulf %152, %152 : vector<2x32xf32>
    %cst_35 = arith.constant dense<0.000000e+00> : vector<2xf32>
    %154 = vector.multi_reduction <add>, %153, %cst_35 [1] : vector<2x32xf32> to vector<2xf32>
    %155 = vector.shape_cast %154 : vector<2xf32> to vector<2x1xf32>
    %cst_36 = arith.constant 3.200000e+01 : f32
    %156 = vector.broadcast %cst_36 : f32 to vector<2x1xf32>
    %157 = arith.divf %155, %156 : vector<2x1xf32>
    %158 = vector.broadcast %150 : vector<2x1xf32> to vector<2x32xf32>
    %159 = arith.subf %146, %158 : vector<2x32xf32>
    %cst_37 = arith.constant 9.99999996E-13 : f32
    %160 = vector.broadcast %cst_37 : f32 to vector<2x1xf32>
    %161 = arith.addf %157, %160 : vector<2x1xf32>
    %162 = math.rsqrt %161 : vector<2x1xf32>
    %163 = vector.broadcast %162 : vector<2x1xf32> to vector<2x32xf32>
    %164 = arith.mulf %159, %163 : vector<2x32xf32>
    %165 = vector.broadcast %12 : vector<1x32xf32> to vector<2x32xf32>
    %166 = arith.mulf %164, %165 : vector<2x32xf32>
    %167 = vector.broadcast %13 : vector<1x32xf32> to vector<2x32xf32>
    %168 = arith.addf %166, %167 : vector<2x32xf32>
    %169 = arith.truncf %168 : vector<2x32xf32> to vector<2x32xbf16>
    %170 = vector.extract_strided_slice %2 {offsets = [0, 256], sizes = [32, 32], strides = [1, 1]} : vector<32x288xbf16> to vector<32x32xbf16>
    %cst_38 = arith.constant dense<0.000000e+00> : vector<2x32xf32>
    %171 = tpu.matmul %169, %170, %cst_38 {dimension_numbers = #tpu.dot_dimension_numbers<[1], [0], [0], [1], [0, 0, 1, 1], [], []>} : vector<2x32xbf16>, vector<32x32xbf16>, vector<2x32xf32> -> vector<2x32xf32>
    %172 = vector.broadcast %14 : vector<1x32xf32> to vector<2x32xf32>
    %173 = arith.addf %171, %172 : vector<2x32xf32>
    %174 = math.tanh %173 : vector<2x32xf32>
    %c0_39 = arith.constant 0 : index
    %c0_40 = arith.constant 0 : index
    %175 = vector.load %arg4[%c0_39, %c0_40] : memref<2x32xf32, #tpu.memory_space<vmem>>, vector<2x32xf32>
    tpu.vector_store %arg4[%c0_39, %c0_40], %174 {strides = array<i32>} : memref<2x32xf32, #tpu.memory_space<vmem>>, vector<2x32xf32>,
    return
  }
}

</mosaic_0001>

<bundles_post_ra>
// kernel: big_model_forward.1
= control target key start
LH: loop header
LB: loop body
LE: loop exit
PB: predicated region body
PF: predicated region fallthrough
CT: control target
= control target key end

     0   :  { %vm32_vm0 = vcmask 261120   ;;  %s1168_s0 = inlined_call_operand.vmem [shape: f32[16,32], index: 0, kind: input, shape index: {}]   ;;  %s1169_s1 = inlined_call_operand.vmem [shape: f32[2,16], index: 1, kind: input, shape index: {}]   ;;  %s1170_s2 = inlined_call_operand.vmem [shape: bf16[32,288], index: 2, kind: input, shape index: {}]   ;;  %s1171_s3 = inlined_call_operand.vmem [shape: f32[11,96], index: 3, kind: input, shape index: {}]   ;;  %s1172_s4 = inlined_call_operand.hbm [shape: f32[2,32], index: 4, kind: output, shape index: {}]  }
   0x1   :  { %v19_v0 = vld [vmem:[%s1168_s0] sm:$0xff]  ;;  %v20_v1 = vld [vmem:[%s1168_s0 + $0x8] sm:$0xff] }
   0x2   :  { %v33_v2 = vsel %vm32_vm0, %v19_v0, 0.0  ;;  %v36_v3 = vsel %vm32_vm0, %v20_v1, 0.0 }
   0x3   :  { %34 = vadd.xlane.f32.xlu0 %v33_v2 }
   0x4   :  { %9 = vsyncpa [#allocation3], 0  ;;  %v1003_v14 = vld [vmem:[%s1170_s2] ss:$12 sps:$4 sm:$0xff]   ;;  %v956_v15 = vmov 0.0   ;;  %vm957_vm1 = vmmov 0   ;;  %v60_v21 = vlaneseq }
   0x5   :  { %822 = vmatprep.subr.bf16.mxu0 %v956_v15  ;;  %830 = vmatprep.subr.bf16.mxu1 %v956_v15  ;;  %v1011_v16 = vld [vmem:[%s1170_s2 + $0x18] ss:$12 sps:$4 sm:$0xff]   ;;  %s958_s24 = smov 96   ;;  %vm141_vm2 = vcmask 1041409   ;;  %s959_s25 = smov 80   ;;  %vm147_vm3 = vcmask 130048  }
   0x6   :  { %823 = vmatpush3.bf16.msra.mxu0 %v1003_v14  ;;  %826 = vmatprep.mubr.msk.bf16.mxu0 %vm957_vm1, %v956_v15  ;;  %v1020_v24 = vshrl.u32 %v60_v21, 7  ;;  %v1026_v26 = vld [vmem:[%s1171_s3] sm:$0xff]  ;;  %vm194_vm4 = vcmask 123904   ;;  %s960_s28 = smov 64   ;;  %s962_s7 = smov 32   ;;  %vm472_vm5 = vcmask 254976  }
   0x7   :  { %37 = vadd.xlane.f32.xlu0 %v36_v3  ;;  %824 = vmatprep.subr.bf16.mxu0 %v956_v15  ;;  %v21_v57 = vld [vmem:[%s1169_s1] sm:$0x3]  ;;  %s961_s1 = smov 112   ;;  %s963_s8 = smov 48   ;;  %vm596_vm6 = vcmask 523264  }
   0x8   :  { %832 = vmatprep.mubr.msk.bf16.mxu1 %vm957_vm1, %v956_v15  ;;  %v62_v25 = vsub.s32 0, %v1020_v24  ;;  %v68_v30 = vsub.s32 1, %v1020_v24  ;;  %v75_v39 = vsub.s32 2, %v1020_v24 }
   0xa   :  { %825 = vmatpush3.bf16.msra.mxu0 %v1011_v16  ;;  %v63_v29 = vrot.slane %v1026_v26, %v62_v25  ;;  %v69_v34 = vrot.slane %v1026_v26, %v68_v30  ;;  %v76_v40 = vrot.slane %v1026_v26, %v75_v39 }
   0xb   :  { %836 = vmatprep.subr.bf16.mxu0 %v956_v15 }
  0x90   :  { %v35_v4 = vpop.xlane.xlu0 %34 }
  0x91   :  { %v40_v5 = vmul.f32 0.03125, %v35_v4 }
  0x93   :  { %v42_v6 = vsub.f32 %v19_v0, %v40_v5 }
  0x94   :  { %v38_v7 = vpop.xlane.xlu0 %37 }
  0x95   :  { %v41_v8 = vmul.f32 0.03125, %v38_v7  ;;  %v44_v9 = vmul.f32 %v42_v6, %v42_v6 }
  0x97   :  { %v43_v10 = vsub.f32 %v20_v1, %v41_v8  ;;  %v46_v11 = vsel %vm32_vm0, %v44_v9, 0.0 }
  0x98   :  { %47 = vadd.xlane.f32.xlu1 %v46_v11 }
  0x99   :  { %v45_v12 = vmul.f32 %v43_v10, %v43_v10 }
  0x9b   :  { %v49_v13 = vsel %vm32_vm0, %v45_v12, 0.0  ;;  %v1074_v12 = vld [vmem:[%s1170_s2 + $0x4] ss:$12 sps:$4 sm:$0xff]  }
  0x9c   :  { %50 = vadd.xlane.f32.xlu1 %v49_v13 }
 0x125   :  { %v48_v17 = vpop.xlane.xlu1 %47 }
 0x126   :  { %v52_v18 = vmul.f32 0.03125, %v48_v17  ;;  %v1080_v17 = vld [vmem:[%s1170_s2 + $0x1c] ss:$12 sps:$4 sm:$0xff]  }
 0x128   :  { %v54_v19 = vadd.f32 1e-12, %v52_v18 }
 0x129   :  { %v51_v20 = vpop.xlane.xlu1 %50 }
 0x12a   :  { %912 = vrsqrt.f32 %v54_v19  ;;  %v53_v22 = vmul.f32 0.03125, %v51_v20 }
 0x12c   :  { %v55_v23 = vadd.f32 1e-12, %v53_v22 }
 0x12e   :  { %914 = vrsqrt.f32 %v55_v23 }
 0x134   :  { %v913_v27 = vpop.eup %912 }
 0x135   :  { %v58_v28 = vmul.f32 %v913_v27, %v42_v6 }
 0x137   :  { %v64_v33 = vmul.f32 %v63_v29, %v58_v28 }
 0x138   :  { %v915_v31 = vpop.eup %914 }
 0x139   :  { %v59_v32 = vmul.f32 %v915_v31, %v43_v10  ;;  %v1035_v36 = vadd.f32 %v69_v34, %v64_v33 }
 0x13b   :  { %v65_v35 = vmul.f32 %v63_v29, %v59_v32 }
 0x13d   :  { %v1037_v37 = vadd.f32 %v69_v34, %v65_v35 }
 0x13f   :  { %v72_v38 = vpack.c.bf16 %v1037_v37, %v1035_v36 }
 0x141   :  { %827 = vmatmul.mubr.msk.bf16.vlgmr.msra.gmra.mrb[0].mxu0 %vm32_vm0, %v72_v38 }
 0x142   :  { %838 = vmatprep.mubr.msk.bf16.mxu0 %vm957_vm1, %v956_v15 }
 0x214   :  { %v126_v41 = vpop.f32.mrb[0].mxu0 }
 0x215   :  { %v127_v42 = vadd.f32 %v126_v41, %v76_v40  ;;  %v828_v43 = vpop.f32.mrb[1].mxu0 }
 0x216   :  { %v129_v44 = vpop.f32.mrb[2].mxu0 }
 0x217   :  { %v130_v45 = vadd.f32 %v129_v44, %v76_v40  ;;  %v829_v46 = vpop.f32.mrb[3].mxu0  ;;  %v133_v47 = vpack.c.bf16 %v127_v42, %v127_v42 }
 0x219   :  { %v134_v48 = vpack.c.bf16 %v130_v45, %v130_v45  ;;  %v1048_v49 = vpack.c.bf16 %v130_v45, %v127_v42  ;;  %v138_v51 = vunpack.c.l.b16 %v133_v47 }
 0x21b   :  { %v139_v50 = vunpack.c.l.b16 %v134_v48  ;;  %145 = vrot.lane.b32.xlu0 %v1048_v49, %s958_s24 }
 0x21d   :  { %v140_v52 = vrot.slane %v139_v50, 7 }
 0x21f   :  { %307 = vrot.lane.b32.xlu0 %v1048_v49, %s959_s25  ;;  %v142_v53 = vsel %vm141_vm2, %v140_v52, %v138_v51  ;;  %v302_v51 = vsub.s32 3, %v1020_v24 }
 0x220   :  { %v143_v56 = vpack.c.b16 %v142_v53, %v142_v53 }
 0x221   :  { %v303_v52 = vrot.slane %v1026_v26, %v302_v51 }
 0x28d   :  { %v146_v54 = vpop.permute.xlu0 %145 }
 0x28e   :  { %v152_v55 = vsel %vm147_vm3, %v146_v54, 0 }
 0x28f   :  { %831 = vmatpush3.bf16.xpose.msra.mxu1 %v152_v55 }
 0x290   :  { %842 = vmatprep.subr.bf16.mxu1 %v956_v15 }
 0x291   :  { %v308_v9 = vpop.permute.xlu0 %307 }
 0x292   :  { %v313_v11 = vsel %vm147_vm3, %v308_v9, 0 }
 0x296   :  { %833 = vmatmul.mubr.msk.bf16.vlgmr.msra.gmra.mrb[0].mxu1 %vm147_vm3, %v143_v56 }
 0x297   :  { %844 = vmatprep.mubr.msk.bf16.mxu1 %vm957_vm1, %v956_v15 }
 0x369   :  { %v188_v58 = vpop.f32.mrb[0].mxu1 }
 0x36a   :  { %v189_v59 = vadd.f32 %v188_v58, %v21_v57  ;;  %v834_v60 = vpop.f32.mrb[1].mxu1 }
 0x36b   :  { %v191_v61 = vpop.f32.mrb[2].mxu1 }
 0x36c   :  { %v835_v62 = vpop.f32.mrb[3].mxu1  ;;  %v195_v63 = vsel %vm194_vm4, %v189_v59, -inf }
 0x36d   :  { %196 = vmax.xlane.f32.xlu1 %v195_v63 }
 0x3fa   :  { %v197_v0 = vpop.xlane.xlu1 %196 }
 0x3fb   :  { %v198_v1 = vsub.f32 %v189_v59, %v197_v0 }
 0x3fd   :  { %v199_v2 = vmul.f32 1.442695, %v198_v1 }
 0x3ff   :  { %916 = vpow2.f32 %v199_v2 }
 0x409   :  { %v917_v3 = vpop.eup %916 }
 0x40a   :  { %v201_v4 = vsel %vm194_vm4, %v917_v3, 0.0 }
 0x40b   :  { %202 = vadd.xlane.f32.xlu1 %v201_v4 }
 0x41c   :  { %207 = vrot.lane.b32.xlu1 %v1048_v49, %s960_s28 }
 0x420   :  { %305 = vrot.lane.b32.xlu1 %v143_v56, %s961_s1 }
 0x498   :  { %v203_v5 = vpop.xlane.xlu1 %202 }
 0x499   :  { %918 = vrcp.f32 %v203_v5 }
 0x49c   :  { %v208_v6 = vpop.permute.xlu1 %207 }
 0x49d   :  { %837 = vmatpush3.bf16.msra.mxu0 %v208_v6 }
 0x49e   :  { %848 = vmatprep.subr.bf16.mxu0 %v956_v15 }
 0x4a0   :  { %v306_v13 = vpop.permute.xlu1 %305 }
 0x4a3   :  { %v919_v7 = vpop.eup %918 }
 0x4a4   :  { %v205_v8 = vmul.f32 %v919_v7, %v917_v3 }
 0x4a6   :  { %v206_v10 = vpack.c.bf16 %v205_v8, %v205_v8 }
 0x4a8   :  { %839 = vmatmul.mubr.msk.bf16.vlgmr.msra.gmra.mrb[4].mxu0 %vm147_vm3, %v206_v10 }
 0x4a9   :  { %849 = vmatpush3.bf16.xpose.msra.mxu0 %v313_v11  ;;  %850 = vmatprep.mubr.msk.bf16.mxu0 %vm957_vm1, %v956_v15  ;;  %v504_v11 = vsub.s32 4, %v1020_v24 }
 0x4aa   :  { %866 = vmatprep.subr.bf16.mxu0 %v956_v15 }
 0x4b0   :  { %851 = vmatmul.mubr.msk.bf16.vlgmr.msra.gmra.mrb[8].mxu0 %vm147_vm3, %v306_v13  ;;  %v510_v13 = vsub.s32 5, %v1020_v24 }
 0x4b1   :  { %867 = vmatpush3.bf16.msra.mxu0 %v1074_v12  ;;  %870 = vmatprep.mubr.msk.bf16.mxu0 %vm957_vm1, %v956_v15 }
 0x4b2   :  { %868 = vmatprep.subr.bf16.mxu0 %v956_v15 }
 0x4b5   :  { %869 = vmatpush3.bf16.msra.mxu0 %v1080_v17 }
 0x4b6   :  { %874 = vmatprep.subr.bf16.mxu0 %v956_v15 }
 0x57b   :  { %v247_v18 = vpop.f32.mrb[4].mxu0 }
 0x57c   :  { %v840_v19 = vpop.f32.mrb[5].mxu0  ;;  %v253_v38 = vpack.c.bf16 %v247_v18, %v247_v18 }
 0x57d   :  { %v250_v20 = vpop.f32.mrb[6].mxu0  ;;  %v511_v19 = vrot.slane %v1026_v26, %v510_v13 }
 0x57e   :  { %v841_v21 = vpop.f32.mrb[7].mxu0 }
 0x583   :  { %v349_v22 = vpop.f32.mrb[8].mxu0 }
 0x584   :  { %v350_v23 = vadd.f32 %v349_v22, %v21_v57  ;;  %v852_v27 = vpop.f32.mrb[9].mxu0 }
 0x585   :  { %v352_v28 = vpop.f32.mrb[10].mxu0 }
 0x586   :  { %v853_v29 = vpop.f32.mrb[11].mxu0  ;;  %v355_v31 = vsel %vm194_vm4, %v350_v23, -inf }
 0x587   :  { %356 = vmax.xlane.f32.xlu0 %v355_v31 }
 0x59d   :  { %254 = vrot.lane.b32.xlu0 %v1003_v14, %s962_s7 }
 0x5a1   :  { %414 = vrot.lane.b32.xlu0 %v1011_v16, %s962_s7 }
 0x614   :  { %v357_v32 = vpop.xlane.xlu0 %356 }
 0x615   :  { %v358_v33 = vsub.f32 %v350_v23, %v357_v32 }
 0x617   :  { %v359_v34 = vmul.f32 1.442695, %v358_v33 }
 0x618   :  { %v255_v35 = vpop.permute.xlu0 %254 }
 0x619   :  { %920 = vpow2.f32 %v359_v34  ;;  %843 = vmatpush3.bf16.msra.mxu1 %v255_v35 }
 0x61a   :  { %854 = vmatprep.subr.bf16.mxu1 %v956_v15 }
 0x61c   :  { %845 = vmatmul.mubr.msk.bf16.vlgmr.msra.gmra.mrb[4].mxu1 %vm147_vm3, %v253_v38  ;;  %v415_v45 = vpop.permute.xlu0 %414 }
 0x61d   :  { %856 = vmatprep.mubr.msk.bf16.mxu1 %vm957_vm1, %v956_v15 }
 0x623   :  { %v921_v40 = vpop.eup %920 }
 0x624   :  { %v361_v41 = vsel %vm194_vm4, %v921_v40, 0.0 }
 0x625   :  { %362 = vadd.xlane.f32.xlu1 %v361_v41 }
 0x636   :  { %367 = vrot.lane.b32.xlu1 %v1048_v49, %s963_s8 }
 0x6b2   :  { %v363_v14 = vpop.xlane.xlu1 %362 }
 0x6b3   :  { %922 = vrcp.f32 %v363_v14 }
 0x6b6   :  { %v368_v16 = vpop.permute.xlu1 %367 }
 0x6b7   :  { %855 = vmatpush3.bf16.msra.mxu1 %v368_v16 }
 0x6b8   :  { %860 = vmatprep.subr.bf16.mxu1 %v956_v15 }
 0x6bd   :  { %v923_v42 = vpop.eup %922 }
 0x6be   :  { %v365_v43 = vmul.f32 %v923_v42, %v921_v40  ;;  %v518_v42 = vsub.s32 6, %v1020_v24 }
 0x6c0   :  { %v366_v44 = vpack.c.bf16 %v365_v43, %v365_v43  ;;  %v519_v43 = vrot.slane %v1026_v26, %v518_v42 }
 0x6c2   :  { %857 = vmatmul.mubr.msk.bf16.vlgmr.msra.gmra.mrb[8].mxu1 %vm147_vm3, %v366_v44 }
 0x6c3   :  { %861 = vmatpush3.bf16.msra.mxu1 %v415_v45  ;;  %862 = vmatprep.mubr.msk.bf16.mxu1 %vm957_vm1, %v956_v15 }
 0x6c4   :  { %882 = vmatprep.subr.bf16.mxu1 %v956_v15 }
 0x795   :  { %v407_v46 = vpop.f32.mrb[8].mxu1 }
 0x796   :  { %v413_v47 = vpack.c.bf16 %v407_v46, %v407_v46  ;;  %v858_v48 = vpop.f32.mrb[9].mxu1 }
 0x797   :  { %v410_v49 = vpop.f32.mrb[10].mxu1 }
 0x798   :  { %v859_v50 = vpop.f32.mrb[11].mxu1  ;;  %863 = vmatmul.mubr.msk.bf16.vlgmr.msra.gmra.mrb[4].mxu1 %vm147_vm3, %v413_v47 }
 0x799   :  { %886 = vmatprep.mubr.msk.bf16.mxu1 %vm957_vm1, %v956_v15 }
 0x86b   :  { %v454_v53 = vpop.f32.mrb[4].mxu1 }
 0x86c   :  { %v890_v54 = vadd.f32 %v454_v53, %v303_v52  ;;  %v864_v55 = vpop.f32.mrb[5].mxu1 }
 0x86d   :  { %v457_v56 = vpop.f32.mrb[6].mxu1 }
 0x86e   :  { %v462_v57 = vrot.slane %v890_v54, 1  ;;  %v865_v58 = vpop.f32.mrb[7].mxu1  ;;  %v465_v60 = vadd.f32 %v890_v54, %v1035_v36 }
 0x870   :  { %v466_v59 = vadd.f32 %v462_v57, %v1037_v37 }
 0x872   :  { %v469_v61 = vrot.slane %v466_v59, 7 }
 0x874   :  { %v470_v62 = vsel %vm141_vm2, %v469_v61, %v465_v60 }
 0x875   :  { %v473_v63 = vsel %vm472_vm5, %v470_v62, 0.0 }
 0x876   :  { %474 = vadd.xlane.f32.xlu1 %v473_v63 }
 0x887   :  { %594 = vrot.lane.b32.xlu1 %v1080_v17, %s960_s28  ;;  %v505_v17 = vrot.slane %v1026_v26, %v504_v11 }
 0x903   :  { %v475_v0 = vpop.xlane.xlu1 %474 }
 0x904   :  { %v476_v1 = vmul.f32 0.03125, %v475_v0 }
 0x906   :  { %v478_v2 = vrot.slane %v476_v1, 1  ;;  %v481_v3 = vsub.f32 %v465_v60, %v476_v1 }
 0x907   :  { %v595_v14 = vpop.permute.xlu1 %594 }
 0x908   :  { %v482_v4 = vsub.f32 %v466_v59, %v478_v2  ;;  %v483_v6 = vmul.f32 %v481_v3, %v481_v3  ;;  %v604_v16 = vsel %vm596_vm6, %v595_v14, 0  ;;  %v590_v59 = vsub.s32 7, %v1020_v24 }
 0x90a   :  { %v484_v5 = vmul.f32 %v482_v4, %v482_v4  ;;  %v591_v60 = vrot.slane %v1026_v26, %v590_v59 }
 0x90c   :  { %v487_v37 = vrot.slane %v484_v5, 7 }
 0x90e   :  { %v488_v36 = vsel %vm141_vm2, %v487_v37, %v483_v6 }
 0x90f   :  { %v490_v7 = vsel %vm472_vm5, %v488_v36, 0.0 }
 0x910   :  { %491 = vadd.xlane.f32.xlu0 %v490_v7 }
 0x926   :  { %592 = vrot.lane.b32.xlu0 %v1074_v12, %s960_s28 }
 0x99d   :  { %v492_v8 = vpop.xlane.xlu0 %491 }
 0x99e   :  { %v493_v9 = vmul.f32 0.03125, %v492_v8 }
 0x9a0   :  { %v494_v10 = vadd.f32 1e-12, %v493_v9 }
 0x9a1   :  { %v593_v40 = vpop.permute.xlu0 %592 }
 0x9a2   :  { %924 = vrsqrt.f32 %v494_v10  ;;  %v601_v41 = vsel %vm596_vm6, %v593_v40, 0 }
 0x9ac   :  { %v925_v18 = vpop.eup %924 }
 0x9ad   :  { %v497_v20 = vrot.slane %v925_v18, 1  ;;  %v500_v21 = vmul.f32 %v925_v18, %v481_v3 }
 0x9af   :  { %v501_v22 = vmul.f32 %v497_v20, %v482_v4  ;;  %v506_v23 = vmul.f32 %v505_v17, %v500_v21  ;;  %v911_v20 = vld [vmem:[%s1170_s2 + $0x20] ss:$12 sps:$4 sm:$0xff]  }
 0x9b1   :  { %v507_v27 = vmul.f32 %v505_v17, %v501_v22  ;;  %v512_v28 = vadd.f32 %v511_v19, %v506_v23 }
 0x9b3   :  { %v513_v12 = vadd.f32 %v511_v19, %v507_v27  ;;  %v514_v29 = vpack.c.bf16 %v512_v28, %v512_v28  ;;  %v910_v19 = vld [vmem:[%s1170_s2 + $0x8] ss:$12 sps:$4 sm:$0xff]   ;;  %s964_s2 = smov [#allocation2]  }
 0x9b4   :  { %883 = vmatpush3.bf16.msra.mxu1 %v910_v19  ;;  %v31_v27 = vld [vmem:[%s1171_s3 + $0x8] sm:$0x7]  ;;  %s774_s3 = sshll.u32 %s964_s2, 4  ;;  %s775_s3 = int_to_ptr.vmem [resolvable:$true] %s774_s3 }
 0x9b5   :  { %v515_v31 = vpack.c.bf16 %v513_v12, %v513_v12  ;;  %v522_v33 = vunpack.c.l.b16 %v514_v29  ;;  %884 = vmatprep.subr.bf16.mxu1 %v956_v15  ;;  %v695_v29 = vrot.slane %v31_v27, %v68_v30  ;;  %s932_s15 = scalar_lea.vmem %s775_s3, 32  ;;  %p937_p1 = scmp.lt.s32.totalorder %s775_s3, %s775_s3 }
 0x9b6   :  { %p933_p0 = scmp.ne.s32.totalorder %s775_s3, %s932_s15  ;;  %p938_p2 = scmp.lt.s32.totalorder %s932_s15, %s932_s15 }
 0x9b7   :  { %v523_v32 = vunpack.c.l.b16 %v515_v31 }
 0x9b8   :  { %885 = vmatpush3.bf16.msra.mxu1 %v911_v20  ;;  %p939_p3 = por %p938_p2, %p937_p1 }
 0x9b9   :  { %v524_v34 = vrot.slane %v523_v32, 7 }
 0x9ba   :  { %p940_p4 = pnand %p939_p3, %p933_p0 }
 0x9bb   :  { %v525_v35 = vsel %vm141_vm2, %v524_v34, %v522_v33 }
 0x9bc   :  { %v526_v38 = vpack.c.b16 %v525_v35, %v525_v35 }
 0x9be   :  { %871 = vmatmul.mubr.msk.bf16.vlgmr.msra.gmra.mrb[12].mxu0 %vm32_vm0, %v526_v38 }
 0x9bf   :  { %878 = vmatprep.mubr.msk.bf16.mxu0 %vm957_vm1, %v956_v15  ;;  %875 = vmatpush3.bf16.xpose.msra.mxu0 %v601_v41 }
 0x9c0   :  { %876 = vmatprep.subr.bf16.mxu0 %v956_v15 }
 0x9c7   :  { %877 = vmatpush3.bf16.xpose.msra.mxu0 %v604_v16 }
 0xa91   :  { %v572_v44 = vpop.f32.mrb[12].mxu0 }
 0xa92   :  { %v573_v45 = vadd.f32 %v572_v44, %v519_v43  ;;  %v872_v46 = vpop.f32.mrb[13].mxu0 }
 0xa93   :  { %v575_v47 = vpop.f32.mrb[14].mxu0 }
 0xa94   :  { %v578_v48 = vmul.f32 %v573_v45, %v573_v45  ;;  %v873_v49 = vpop.f32.mrb[15].mxu0 }
 0xa96   :  { %v579_v50 = vmul.f32 %v578_v48, %v573_v45 }
 0xa98   :  { %v580_v51 = vmul.f32 0.044715, %v579_v50 }
 0xa9a   :  { %v581_v52 = vadd.f32 %v580_v51, %v573_v45 }
 0xa9c   :  { %v582_v53 = vmul.f32 0.7978846, %v581_v52 }
 0xa9e   :  { %926 = vtanh.f32 %v582_v53 }
 0xaa8   :  { %v927_v54 = vpop.eup %926 }
 0xaa9   :  { %v584_v55 = vadd.f32 1.0, %v927_v54 }
 0xaab   :  { %v585_v56 = vmul.f32 0.5, %v584_v55 }
 0xaad   :  { %v586_v57 = vmul.f32 %v585_v56, %v573_v45 }
 0xaaf   :  { %v587_v58 = vpack.c.bf16 %v586_v57, %v586_v57 }
 0xab1   :  { %879 = vmatmul.mubr.msk.bf16.vlgmr.msra.gmra.mrb[16].mxu0 %vm596_vm6, %v587_v58 }
 0xb84   :  { %v640_v61 = vpop.f32.mrb[16].mxu0 }
 0xb85   :  { %v641_v62 = vadd.f32 %v640_v61, %v591_v60  ;;  %v880_v63 = vpop.f32.mrb[17].mxu0 }
 0xb86   :  { %v643_v0 = vpop.f32.mrb[18].mxu0 }
 0xb87   :  { %v647_v1 = vrot.slane %v641_v62, 1  ;;  %v881_v2 = vpop.f32.mrb[19].mxu0  ;;  %v650_v4 = vadd.f32 %v641_v62, %v512_v28  ;;  %v689_v28 = vrot.slane %v31_v27, %v62_v25  ;;  %v703_v25 = vrot.slane %v31_v27, %v75_v39 }
 0xb89   :  { %v651_v3 = vadd.f32 %v647_v1, %v513_v12 }
 0xb8b   :  { %v654_v5 = vrot.slane %v651_v3, 7 }
 0xb8d   :  { %v655_v6 = vsel %vm141_vm2, %v654_v5, %v650_v4 }
 0xb8e   :  { %v657_v37 = vsel %vm472_vm5, %v655_v6, 0.0 }
 0xb8f   :  { %658 = vadd.xlane.f32.xlu1 %v657_v37 }
 0xc1c   :  { %v659_v36 = vpop.xlane.xlu1 %658 }
 0xc1d   :  { %v660_v7 = vmul.f32 0.03125, %v659_v36 }
 0xc1f   :  { %v662_v8 = vrot.slane %v660_v7, 1  ;;  %v665_v9 = vsub.f32 %v650_v4, %v660_v7 }
 0xc21   :  { %v666_v10 = vsub.f32 %v651_v3, %v662_v8  ;;  %v667_v11 = vmul.f32 %v665_v9, %v665_v9 }
 0xc23   :  { %v668_v26 = vmul.f32 %v666_v10, %v666_v10 }
 0xc25   :  { %v671_v13 = vrot.slane %v668_v26, 7 }
 0xc27   :  { %v672_v17 = vsel %vm141_vm2, %v671_v13, %v667_v11 }
 0xc28   :  { %v674_v18 = vsel %vm472_vm5, %v672_v17, 0.0 }
 0xc29   :  { %675 = vadd.xlane.f32.xlu0 %v674_v18 }
 0xcb6   :  { %v676_v21 = vpop.xlane.xlu0 %675 }
 0xcb7   :  { %v677_v22 = vmul.f32 0.03125, %v676_v21 }
 0xcb9   :  { %v678_v23 = vadd.f32 1e-12, %v677_v22 }
 0xcbb   :  { %928 = vrsqrt.f32 %v678_v23 }
 0xcc5   :  { %v929_v12 = vpop.eup %928 }
 0xcc6   :  { %v681_v31 = vrot.slane %v929_v12, 1  ;;  %v684_v32 = vmul.f32 %v929_v12, %v665_v9 }
 0xcc8   :  { %v685_v33 = vmul.f32 %v681_v31, %v666_v10  ;;  %v690_v15 = vmul.f32 %v689_v28, %v684_v32 }
 0xcca   :  { %v691_v34 = vmul.f32 %v689_v28, %v685_v33  ;;  %v696_v35 = vadd.f32 %v695_v29, %v690_v15 }
 0xccc   :  { %v697_v38 = vadd.f32 %v695_v29, %v691_v34  ;;  %v698_v40 = vpack.c.bf16 %v696_v35, %v696_v35 }
 0xcce   :  { %v699_v41 = vpack.c.bf16 %v697_v38, %v697_v38  ;;  %v706_v16 = vunpack.c.l.b16 %v698_v40 }
 0xcd0   :  { %v707_v14 = vunpack.c.l.b16 %v699_v41 }
 0xcd2   :  { %v708_v42 = vrot.slane %v707_v14, 7 }
 0xcd4   :  { %v709_v43 = vsel %vm141_vm2, %v708_v42, %v706_v16 }
 0xcd5   :  { %v710_v44 = vpack.c.b16 %v709_v43, %v709_v43 }
 0xcd7   :  { %887 = vmatmul.mubr.msk.bf16.vlgmr.msra.gmra.mrb[12].mxu1 %vm32_vm0, %v710_v44 }
 0xdaa   :  { %v760_v30 = vpop.f32.mrb[12].mxu1 }
 0xdab   :  { %v761_v45 = vadd.f32 %v760_v30, %v703_v25  ;;  %v888_v46 = vpop.f32.mrb[13].mxu1 }
 0xdac   :  { %v763_v47 = vpop.f32.mrb[14].mxu1 }
 0xdad   :  { %930 = vtanh.f32 %v761_v45  ;;  %v889_v48 = vpop.f32.mrb[15].mxu1 }
 0xdb7   :  { %v931_v49 = vpop.eup %930 }
 0xdb8   :  { %767 = vst.msk [vmem:[#allocation2] sm:$0x3] %vm472_vm5, %v931_v49 }
 0xdb9   :  { %943 = shalt.err (!%p940_p4)
}
 0xdba   :  { %s944_s18 = scalar_lea.hbm %s1172_s4, 32 }
 0xdbb   :  { %p945_p5 = scmp.ne.s32.totalorder %s1172_s4, %s944_s18  ;;  %p948_p6 = scmp.lt.u32.totalorder %s944_s18, %s1172_s4 }
 0xdbd   :  { %p950_p7 = pnand %p948_p6, %p945_p5 }
 0xdbf   :  { %953 = shalt.err (!%p950_p7)
}
 0xdc0   :  { %777 = dma.vmem_to_hbm [thread:$0]  %s775_s3, 32, %s1172_s4, [#allocation3]  }
 0xdc1   :  { %954 = dma.done.wait [#allocation3], 32  }
 0xdc2   :  { %955 = vsyncadd [#allocation3], 4294967264 }
 0xdc3   :  { %781 = vsyncpa [#allocation3], 1 }

</bundles_post_ra>
